<compile_context>
chip_gen: v7x
topology: tpu7x:2x2x1
jax: 0.10.0
libtpu: 0.0.40
codegen_flags: <defaults>
</compile_context>

<pallas_src>
import numpy as np
import jax
import jax.numpy as jnp
from jax.experimental import pallas as pl
from jax.experimental.pallas import tpu as pltpu

_LANE = 128
_MIN_PALLAS_BATCH = 64  # below this a fused XLA gather beats kernel launch cost
_ROWS_PER_STEP = 8      # R: one full (8, 128) sublane tile per grid step


def _round_up(x, m):
    return (x + m - 1) // m * m


def _turn_index(lens, num_turns):
    """Index of the last valid turn.

    Matches PyTorch/numpy `context[b, lens - 1]`: lens == 0 wraps to the last
    turn (index -1).  lens > num_turns is clamped to the last turn because TPU
    refs have no runtime OOB check.
    """
    idx = jnp.where(lens > 0, lens - 1, num_turns - 1)
    return jnp.clip(idx, 0, num_turns - 1)


# ----------------------------------------------------------------------------
# Pallas kernel: batched data-dependent row gather (scalar-prefetched lens)
# ----------------------------------------------------------------------------
def _make_gather_kernel(num_turns, rows_per_step):
    T, R = num_turns, rows_per_step

    def kernel(lens_ref, ctx_ref, out_ref, stage_ref, sem_ref):
        # lens_ref : SMEM (B_pad,) int32      (scalar prefetch)
        # ctx_ref  : HBM  (B_pad*T, U_pad)    (memory_space=pl.ANY, no auto-DMA)
        # out_ref  : VMEM (R, U_pad)          (auto-pipelined output block)
        # stage_ref: VMEM (R, U_pad) scratch
        # sem_ref  : DMA semaphores (R,)
        i = pl.program_id(0)

        # Issue R independent row DMAs, one semaphore each, so all R copies
        # are in flight concurrently (the kernel is DMA-latency bound).
        for r in range(R):
            b = i * R + r
            turn = _turn_index(lens_ref[b], T)
            row = b * T + turn
            pltpu.make_async_copy(
                ctx_ref.at[pl.ds(row, 1)],
                stage_ref.at[pl.ds(r, 1)],
                sem_ref.at[r],
            ).start()

        # Drain all R copies.
        for r in range(R):
            pltpu.make_async_copy(
                ctx_ref.at[pl.ds(0, 1)],
                stage_ref.at[pl.ds(r, 1)],
                sem_ref.at[r],
            ).wait()

        # One dense, lane-aligned (R, U_pad) store; HBM writeback of this
        # block overlaps the next grid step via the built-in pipeline.
        out_ref[...] = stage_ref[...]

    return kernel


def _extract_short_ctx_pallas(context, context_lens, rows_per_step=_ROWS_PER_STEP):
    context = jnp.asarray(context)
    lens = jnp.asarray(context_lens, jnp.int32)
    B, T, U = context.shape
    R = rows_per_step

    B_pad = _round_up(B, R)
    U_pad = _round_up(U, _LANE)  # keep blocks lane-dense (unmasked stores)

    ctx = context
    if U_pad != U:
        ctx = jnp.pad(ctx, ((0, 0), (0, 0), (0, U_pad - U)))
    if B_pad != B:
        ctx = jnp.pad(ctx, ((0, B_pad - B), (0, 0), (0, 0)))
        lens = jnp.pad(lens, (0, B_pad - B), constant_values=1)

    # Flatten so each dialog turn is one contiguous (1, U_pad) HBM row.
    ctx_flat = ctx.reshape(B_pad * T, U_pad)

    out = pl.pallas_call(
        _make_gather_kernel(T, R),
        out_shape=jax.ShapeDtypeStruct((B_pad, U_pad), context.dtype),
        grid_spec=pltpu.PrefetchScalarGridSpec(
            num_scalar_prefetch=1,
            grid=(B_pad // R,),
            in_specs=[
                # Context stays in HBM; rows are gathered manually by DMA.
                pl.BlockSpec(memory_space=pl.ANY),
            ],
            out_specs=pl.BlockSpec((R, U_pad), lambda i, lens_ref: (i, 0)),
            scratch_shapes=[
                pltpu.VMEM((R, U_pad), context.dtype),
                pltpu.SemaphoreType.DMA((R,)),
            ],
        ),
        compiler_params=pltpu.CompilerParams(
            # Steps are self-contained -> safe to shard across the two v7x TCs.
            dimension_semantics=("parallel",),
        ),
    )(lens, ctx_flat)
    return out[:B, :U]


def _extract_short_ctx_xla(context, context_lens):
    context = jnp.asarray(context)
    lens = jnp.asarray(context_lens, jnp.int32)
    B, T, _ = context.shape
    idx = _turn_index(lens, T)
    return context[jnp.arange(B), idx]


def extract_short_ctx(context, context_lens, backward_size=1, *,
                      use_pallas=None, rows_per_step=_ROWS_PER_STEP):
    """context: [B, T, U], context_lens: [B] -> [B, U].

    Matches BaseModel.extract_short_ctx (gathers the single last valid turn);
    backward_size is accepted for API parity but unused, as in the original.
    Dispatches to a fused XLA gather for small B (kernel launch cost dominates
    there); use_pallas=True/False forces the path.
    """
    del backward_size
    B = context.shape[0]
    if use_pallas is None:
        use_pallas = B >= _MIN_PALLAS_BATCH
    if not use_pallas:
        return _extract_short_ctx_xla(context, context_lens)
    return _extract_short_ctx_pallas(context, context_lens, rows_per_step)


# ----------------------------------------------------------------------------
# valid_loss: summing <10 scalars is pure overhead as a Pallas kernel; plain
# JAX addition is a strict win on every TPU generation.
# ----------------------------------------------------------------------------
def valid_loss(loss_dict, batch_cnt=None):
    del batch_cnt  # base class ignores it, same as PyTorch
    total = jnp.float32(0.0)
    for v in loss_dict.values():
        if v is not None:
            total = total + jnp.asarray(v, jnp.float32).reshape(())
    return total


# ----------------------------------------------------------------------------
# Thin module-like wrapper mirroring BaseModel's interface
# ----------------------------------------------------------------------------
class PallasBaseModel:
    def __init__(self, config=None):
        self.config = config
        self.kl_w = 0.0

    def np2var(self, inputs, dtype=jnp.float32):
        if inputs is None:
            return None
        return jnp.asarray(inputs, dtype)

    def forward(self, *inputs):
        # TODO(synk): BaseModel.forward raises NotImplementedError in PyTorch;
        # subclasses define the actual network, so nothing to lower here.
        raise NotImplementedError

    def valid_loss(self, loss, batch_cnt=None):
        return valid_loss(loss, batch_cnt)

    def model_sel_loss(self, loss, batch_cnt):
        return self.valid_loss(loss, batch_cnt)

    def extract_short_ctx(self, context, context_lens, backward_size=1, **kw):
        return extract_short_ctx(context, context_lens, backward_size, **kw)

    def flatten_context(self, context, context_lens, align_right=False):
        # Pure host-side ragged preprocessing (variable-length python lists);
        # kept as numpy glue, identical semantics to the PyTorch version.
        context = np.asarray(context)
        utts, temp_lens = [], []
        for b_id in range(context.shape[0]):
            temp = []
            for t_id in range(int(context_lens[b_id])):
                for token in context[b_id, t_id]:
                    if token != 0:
                        temp.append(token)
            temp_lens.append(len(temp))
            utts.append(temp)
        max_temp_len = int(np.max(temp_lens)) if temp_lens else 0
        # Keep the token dtype (the PyTorch version silently returned float64).
        results = np.zeros((context.shape[0], max_temp_len), dtype=context.dtype)
        for b_id in range(context.shape[0]):
            if temp_lens[b_id] == 0:
                continue
            if align_right:
                results[b_id, -temp_lens[b_id]:] = utts[b_id]
            else:
                results[b_id, 0:temp_lens[b_id]] = utts[b_id]
        return results


# ----------------------------------------------------------------------------
if __name__ == "__main__":
    key = jax.random.PRNGKey(0)
    k1, k2, k3, k4 = jax.random.split(key, 4)

    model = PallasBaseModel()

    # --- Case 1: lane-dense U, R-aligned batch; exercises the Pallas gather.
    B, T, U = 16, 4, 128
    context = jax.random.randint(k1, (B, T, U), 1, 100, dtype=jnp.int32)
    context_lens = jnp.array(
        [3, 2, 4, 1, 0, 2, 3, 4, 1, 2, 3, 4, 0, 1, 2, 3], dtype=jnp.int32
    )
    short = model.extract_short_ctx(context, context_lens, use_pallas=True)
    short = jax.block_until_ready(short)
    # Reference uses the same semantics as numpy/PyTorch indexing
    # (lens == 0 -> index -1 -> last turn).
    ref_short = jnp.stack(
        [context[b, int(context_lens[b]) - 1] for b in range(B)]
    )
    assert short.shape == (B, U)
    assert jnp.array_equal(short, ref_short), "extract_short_ctx (pallas) mismatch"

    # Auto-dispatch (small B -> XLA gather) agrees with the kernel.
    short_xla = jax.block_until_ready(model.extract_short_ctx(context, context_lens))
    assert jnp.array_equal(short_xla, ref_short), "extract_short_ctx (xla) mismatch"

    # --- Case 2: ragged shapes; exercises batch + lane padding in the wrapper.
    B2, T2, U2 = 5, 3, 144
    context2 = jax.random.randint(k2, (B2, T2, U2), 1, 50, dtype=jnp.int32)
    lens2 = jnp.array([1, 3, 2, 0, 3], dtype=jnp.int32)
    short2 = jax.block_until_ready(
        model.extract_short_ctx(context2, lens2, use_pallas=True)
    )
    ref_short2 = jnp.stack([context2[b, int(lens2[b]) - 1] for b in range(B2)])
    assert short2.shape == (B2, U2)
    assert jnp.array_equal(short2, ref_short2), "extract_short_ctx (padded) mismatch"

    # --- valid_loss / model_sel_loss (plain JAX) ---
    loss = {
        "nll": jax.random.normal(k3, (), dtype=jnp.float32),
        "kl": jax.random.normal(k4, (), dtype=jnp.float32),
        "aux": None,
    }
    total = jax.block_until_ready(model.model_sel_loss(loss, batch_cnt=1))
    ref_total = loss["nll"] + loss["kl"]
    assert jnp.allclose(total, ref_total, rtol=1e-6, atol=1e-6), "valid_loss mismatch"

    print("KERNEL_OK")
</pallas_src>

<mosaic_0001>
module attributes {stable_mosaic.version = 11 : i64} {
  func.func @kernel(%arg0: i32, %arg1: memref<16xi32, #tpu.memory_space<smem>>, %arg2: memref<64x128xi32, #tpu.memory_space<any>>, %arg3: memref<8x128xi32, #tpu.memory_space<vmem>>, %arg4: memref<8x128xi32, #tpu.memory_space<vmem>>, %arg5: memref<8x!tpu.dma_semaphore, #tpu.memory_space<semaphore_mem>>) attributes {dimension_semantics = [#tpu.dimension_semantics<parallel>], iteration_bounds = array<i64: 2>, scalar_prefetch = 1 : i64, scratch_operands = 2 : i64, tpu.core_type = #tpu.core_type<tc>, window_params = [{}, {transform_indices = @transform_1, window_bounds = array<i64: 8, 128>}]} {
    %c8_i32 = arith.constant 8 : i32
    %0 = arith.muli %arg0, %c8_i32 : i32
    %c0_i32 = arith.constant 0 : i32
    %1 = arith.addi %0, %c0_i32 : i32
    %2 = arith.index_cast %1 : i32 to index
    %3 = memref.load %arg1[%2] : memref<16xi32, #tpu.memory_space<smem>>
    %c0_i32_0 = arith.constant 0 : i32
    %4 = arith.cmpi sgt, %3, %c0_i32_0 : i32
    %c1_i32 = arith.constant 1 : i32
    %5 = arith.subi %3, %c1_i32 : i32
    %c3_i32 = arith.constant 3 : i32
    %6 = arith.select %4, %5, %c3_i32 : i32
    %c0_i32_1 = arith.constant 0 : i32
    %c3_i32_2 = arith.constant 3 : i32
    %7 = arith.maxsi %c0_i32_1, %6 : i32
    %8 = arith.minsi %c3_i32_2, %7 : i32
    %c4_i32 = arith.constant 4 : i32
    %9 = arith.muli %1, %c4_i32 : i32
    %10 = arith.addi %9, %8 : i32
    %c0_i32_3 = arith.constant 0 : i32
    %c0_i32_4 = arith.constant 0 : i32
    %11 = tpu.memref_slice %arg2[%10, %c0_i32_4] : memref<64x128xi32, #tpu.memory_space<any>> -> memref<1x128xi32, #tpu.memory_space<any>>
    %c0_i32_5 = arith.constant 0 : i32
    %c0_i32_6 = arith.constant 0 : i32
    %12 = tpu.memref_slice %arg4[%c0_i32_5, %c0_i32_6] : memref<8x128xi32, #tpu.memory_space<vmem>> -> memref<1x128xi32, #tpu.memory_space<vmem>>
    %13 = tpu.memref_slice %arg5[%c0_i32_3] : memref<8x!tpu.dma_semaphore, #tpu.memory_space<semaphore_mem>> -> memref<1x!tpu.dma_semaphore, #tpu.memory_space<semaphore_mem>>
    %14 = tpu.memref_squeeze %13 : memref<1x!tpu.dma_semaphore, #tpu.memory_space<semaphore_mem>> -> memref<!tpu.dma_semaphore, #tpu.memory_space<semaphore_mem>>
    tpu.enqueue_dma source(%11 : memref<1x128xi32, #tpu.memory_space<any>>) target(%12 : memref<1x128xi32, #tpu.memory_space<vmem>>) target_semaphore(%14 : memref<!tpu.dma_semaphore, #tpu.memory_space<semaphore_mem>>)
    %c8_i32_7 = arith.constant 8 : i32
    %15 = arith.muli %arg0, %c8_i32_7 : i32
    %c1_i32_8 = arith.constant 1 : i32
    %16 = arith.addi %15, %c1_i32_8 : i32
    %17 = arith.index_cast %16 : i32 to index
    %18 = memref.load %arg1[%17] : memref<16xi32, #tpu.memory_space<smem>>
    %c0_i32_9 = arith.constant 0 : i32
    %19 = arith.cmpi sgt, %18, %c0_i32_9 : i32
    %c1_i32_10 = arith.constant 1 : i32
    %20 = arith.subi %18, %c1_i32_10 : i32
    %c3_i32_11 = arith.constant 3 : i32
    %21 = arith.select %19, %20, %c3_i32_11 : i32
    %c0_i32_12 = arith.constant 0 : i32
    %c3_i32_13 = arith.constant 3 : i32
    %22 = arith.maxsi %c0_i32_12, %21 : i32
    %23 = arith.minsi %c3_i32_13, %22 : i32
    %c4_i32_14 = arith.constant 4 : i32
    %24 = arith.muli %16, %c4_i32_14 : i32
    %25 = arith.addi %24, %23 : i32
    %c1_i32_15 = arith.constant 1 : i32
    %c0_i32_16 = arith.constant 0 : i32
    %26 = tpu.memref_slice %arg2[%25, %c0_i32_16] : memref<64x128xi32, #tpu.memory_space<any>> -> memref<1x128xi32, #tpu.memory_space<any>>
    %c1_i32_17 = arith.constant 1 : i32
    %c0_i32_18 = arith.constant 0 : i32
    %27 = tpu.memref_slice %arg4[%c1_i32_17, %c0_i32_18] : memref<8x128xi32, #tpu.memory_space<vmem>> -> memref<1x128xi32, #tpu.memory_space<vmem>>
    %28 = tpu.memref_slice %arg5[%c1_i32_15] : memref<8x!tpu.dma_semaphore, #tpu.memory_space<semaphore_mem>> -> memref<1x!tpu.dma_semaphore, #tpu.memory_space<semaphore_mem>>
    %29 = tpu.memref_squeeze %28 : memref<1x!tpu.dma_semaphore, #tpu.memory_space<semaphore_mem>> -> memref<!tpu.dma_semaphore, #tpu.memory_space<semaphore_mem>>
    tpu.enqueue_dma source(%26 : memref<1x128xi32, #tpu.memory_space<any>>) target(%27 : memref<1x128xi32, #tpu.memory_space<vmem>>) target_semaphore(%29 : memref<!tpu.dma_semaphore, #tpu.memory_space<semaphore_mem>>)
    %c8_i32_19 = arith.constant 8 : i32
    %30 = arith.muli %arg0, %c8_i32_19 : i32
    %c2_i32 = arith.constant 2 : i32
    %31 = arith.addi %30, %c2_i32 : i32
    %32 = arith.index_cast %31 : i32 to index
    %33 = memref.load %arg1[%32] : memref<16xi32, #tpu.memory_space<smem>>
    %c0_i32_20 = arith.constant 0 : i32
    %34 = arith.cmpi sgt, %33, %c0_i32_20 : i32
    %c1_i32_21 = arith.constant 1 : i32
    %35 = arith.subi %33, %c1_i32_21 : i32
    %c3_i32_22 = arith.constant 3 : i32
    %36 = arith.select %34, %35, %c3_i32_22 : i32
    %c0_i32_23 = arith.constant 0 : i32
    %c3_i32_24 = arith.constant 3 : i32
    %37 = arith.maxsi %c0_i32_23, %36 : i32
    %38 = arith.minsi %c3_i32_24, %37 : i32
    %c4_i32_25 = arith.constant 4 : i32
    %39 = arith.muli %31, %c4_i32_25 : i32
    %40 = arith.addi %39, %38 : i32
    %c2_i32_26 = arith.constant 2 : i32
    %c0_i32_27 = arith.constant 0 : i32
    %41 = tpu.memref_slice %arg2[%40, %c0_i32_27] : memref<64x128xi32, #tpu.memory_space<any>> -> memref<1x128xi32, #tpu.memory_space<any>>
    %c2_i32_28 = arith.constant 2 : i32
    %c0_i32_29 = arith.constant 0 : i32
    %42 = tpu.memref_slice %arg4[%c2_i32_28, %c0_i32_29] : memref<8x128xi32, #tpu.memory_space<vmem>> -> memref<1x128xi32, #tpu.memory_space<vmem>>
    %43 = tpu.memref_slice %arg5[%c2_i32_26] : memref<8x!tpu.dma_semaphore, #tpu.memory_space<semaphore_mem>> -> memref<1x!tpu.dma_semaphore, #tpu.memory_space<semaphore_mem>>
    %44 = tpu.memref_squeeze %43 : memref<1x!tpu.dma_semaphore, #tpu.memory_space<semaphore_mem>> -> memref<!tpu.dma_semaphore, #tpu.memory_space<semaphore_mem>>
    tpu.enqueue_dma source(%41 : memref<1x128xi32, #tpu.memory_space<any>>) target(%42 : memref<1x128xi32, #tpu.memory_space<vmem>>) target_semaphore(%44 : memref<!tpu.dma_semaphore, #tpu.memory_space<semaphore_mem>>)
    %c8_i32_30 = arith.constant 8 : i32
    %45 = arith.muli %arg0, %c8_i32_30 : i32
    %c3_i32_31 = arith.constant 3 : i32
    %46 = arith.addi %45, %c3_i32_31 : i32
    %47 = arith.index_cast %46 : i32 to index
    %48 = memref.load %arg1[%47] : memref<16xi32, #tpu.memory_space<smem>>
    %c0_i32_32 = arith.constant 0 : i32
    %49 = arith.cmpi sgt, %48, %c0_i32_32 : i32
    %c1_i32_33 = arith.constant 1 : i32
    %50 = arith.subi %48, %c1_i32_33 : i32
    %c3_i32_34 = arith.constant 3 : i32
    %51 = arith.select %49, %50, %c3_i32_34 : i32
    %c0_i32_35 = arith.constant 0 : i32
    %c3_i32_36 = arith.constant 3 : i32
    %52 = arith.maxsi %c0_i32_35, %51 : i32
    %53 = arith.minsi %c3_i32_36, %52 : i32
    %c4_i32_37 = arith.constant 4 : i32
    %54 = arith.muli %46, %c4_i32_37 : i32
    %55 = arith.addi %54, %53 : i32
    %c3_i32_38 = arith.constant 3 : i32
    %c0_i32_39 = arith.constant 0 : i32
    %56 = tpu.memref_slice %arg2[%55, %c0_i32_39] : memref<64x128xi32, #tpu.memory_space<any>> -> memref<1x128xi32, #tpu.memory_space<any>>
    %c3_i32_40 = arith.constant 3 : i32
    %c0_i32_41 = arith.constant 0 : i32
    %57 = tpu.memref_slice %arg4[%c3_i32_40, %c0_i32_41] : memref<8x128xi32, #tpu.memory_space<vmem>> -> memref<1x128xi32, #tpu.memory_space<vmem>>
    %58 = tpu.memref_slice %arg5[%c3_i32_38] : memref<8x!tpu.dma_semaphore, #tpu.memory_space<semaphore_mem>> -> memref<1x!tpu.dma_semaphore, #tpu.memory_space<semaphore_mem>>
    %59 = tpu.memref_squeeze %58 : memref<1x!tpu.dma_semaphore, #tpu.memory_space<semaphore_mem>> -> memref<!tpu.dma_semaphore, #tpu.memory_space<semaphore_mem>>
    tpu.enqueue_dma source(%56 : memref<1x128xi32, #tpu.memory_space<any>>) target(%57 : memref<1x128xi32, #tpu.memory_space<vmem>>) target_semaphore(%59 : memref<!tpu.dma_semaphore, #tpu.memory_space<semaphore_mem>>)
    %c8_i32_42 = arith.constant 8 : i32
    %60 = arith.muli %arg0, %c8_i32_42 : i32
    %c4_i32_43 = arith.constant 4 : i32
    %61 = arith.addi %60, %c4_i32_43 : i32
    %62 = arith.index_cast %61 : i32 to index
    %63 = memref.load %arg1[%62] : memref<16xi32, #tpu.memory_space<smem>>
    %c0_i32_44 = arith.constant 0 : i32
    %64 = arith.cmpi sgt, %63, %c0_i32_44 : i32
    %c1_i32_45 = arith.constant 1 : i32
    %65 = arith.subi %63, %c1_i32_45 : i32
    %c3_i32_46 = arith.constant 3 : i32
    %66 = arith.select %64, %65, %c3_i32_46 : i32
    %c0_i32_47 = arith.constant 0 : i32
    %c3_i32_48 = arith.constant 3 : i32
    %67 = arith.maxsi %c0_i32_47, %66 : i32
    %68 = arith.minsi %c3_i32_48, %67 : i32
    %c4_i32_49 = arith.constant 4 : i32
    %69 = arith.muli %61, %c4_i32_49 : i32
    %70 = arith.addi %69, %68 : i32
    %c4_i32_50 = arith.constant 4 : i32
    %c0_i32_51 = arith.constant 0 : i32
    %71 = tpu.memref_slice %arg2[%70, %c0_i32_51] : memref<64x128xi32, #tpu.memory_space<any>> -> memref<1x128xi32, #tpu.memory_space<any>>
    %c4_i32_52 = arith.constant 4 : i32
    %c0_i32_53 = arith.constant 0 : i32
    %72 = tpu.memref_slice %arg4[%c4_i32_52, %c0_i32_53] : memref<8x128xi32, #tpu.memory_space<vmem>> -> memref<1x128xi32, #tpu.memory_space<vmem>>
    %73 = tpu.memref_slice %arg5[%c4_i32_50] : memref<8x!tpu.dma_semaphore, #tpu.memory_space<semaphore_mem>> -> memref<1x!tpu.dma_semaphore, #tpu.memory_space<semaphore_mem>>
    %74 = tpu.memref_squeeze %73 : memref<1x!tpu.dma_semaphore, #tpu.memory_space<semaphore_mem>> -> memref<!tpu.dma_semaphore, #tpu.memory_space<semaphore_mem>>
    tpu.enqueue_dma source(%71 : memref<1x128xi32, #tpu.memory_space<any>>) target(%72 : memref<1x128xi32, #tpu.memory_space<vmem>>) target_semaphore(%74 : memref<!tpu.dma_semaphore, #tpu.memory_space<semaphore_mem>>)
    %c8_i32_54 = arith.constant 8 : i32
    %75 = arith.muli %arg0, %c8_i32_54 : i32
    %c5_i32 = arith.constant 5 : i32
    %76 = arith.addi %75, %c5_i32 : i32
    %77 = arith.index_cast %76 : i32 to index
    %78 = memref.load %arg1[%77] : memref<16xi32, #tpu.memory_space<smem>>
    %c0_i32_55 = arith.constant 0 : i32
    %79 = arith.cmpi sgt, %78, %c0_i32_55 : i32
    %c1_i32_56 = arith.constant 1 : i32
    %80 = arith.subi %78, %c1_i32_56 : i32
    %c3_i32_57 = arith.constant 3 : i32
    %81 = arith.select %79, %80, %c3_i32_57 : i32
    %c0_i32_58 = arith.constant 0 : i32
    %c3_i32_59 = arith.constant 3 : i32
    %82 = arith.maxsi %c0_i32_58, %81 : i32
    %83 = arith.minsi %c3_i32_59, %82 : i32
    %c4_i32_60 = arith.constant 4 : i32
    %84 = arith.muli %76, %c4_i32_60 : i32
    %85 = arith.addi %84, %83 : i32
    %c5_i32_61 = arith.constant 5 : i32
    %c0_i32_62 = arith.constant 0 : i32
    %86 = tpu.memref_slice %arg2[%85, %c0_i32_62] : memref<64x128xi32, #tpu.memory_space<any>> -> memref<1x128xi32, #tpu.memory_space<any>>
    %c5_i32_63 = arith.constant 5 : i32
    %c0_i32_64 = arith.constant 0 : i32
    %87 = tpu.memref_slice %arg4[%c5_i32_63, %c0_i32_64] : memref<8x128xi32, #tpu.memory_space<vmem>> -> memref<1x128xi32, #tpu.memory_space<vmem>>
    %88 = tpu.memref_slice %arg5[%c5_i32_61] : memref<8x!tpu.dma_semaphore, #tpu.memory_space<semaphore_mem>> -> memref<1x!tpu.dma_semaphore, #tpu.memory_space<semaphore_mem>>
    %89 = tpu.memref_squeeze %88 : memref<1x!tpu.dma_semaphore, #tpu.memory_space<semaphore_mem>> -> memref<!tpu.dma_semaphore, #tpu.memory_space<semaphore_mem>>
    tpu.enqueue_dma source(%86 : memref<1x128xi32, #tpu.memory_space<any>>) target(%87 : memref<1x128xi32, #tpu.memory_space<vmem>>) target_semaphore(%89 : memref<!tpu.dma_semaphore, #tpu.memory_space<semaphore_mem>>)
    %c8_i32_65 = arith.constant 8 : i32
    %90 = arith.muli %arg0, %c8_i32_65 : i32
    %c6_i32 = arith.constant 6 : i32
    %91 = arith.addi %90, %c6_i32 : i32
    %92 = arith.index_cast %91 : i32 to index
    %93 = memref.load %arg1[%92] : memref<16xi32, #tpu.memory_space<smem>>
    %c0_i32_66 = arith.constant 0 : i32
    %94 = arith.cmpi sgt, %93, %c0_i32_66 : i32
    %c1_i32_67 = arith.constant 1 : i32
    %95 = arith.subi %93, %c1_i32_67 : i32
    %c3_i32_68 = arith.constant 3 : i32
    %96 = arith.select %94, %95, %c3_i32_68 : i32
    %c0_i32_69 = arith.constant 0 : i32
    %c3_i32_70 = arith.constant 3 : i32
    %97 = arith.maxsi %c0_i32_69, %96 : i32
    %98 = arith.minsi %c3_i32_70, %97 : i32
    %c4_i32_71 = arith.constant 4 : i32
    %99 = arith.muli %91, %c4_i32_71 : i32
    %100 = arith.addi %99, %98 : i32
    %c6_i32_72 = arith.constant 6 : i32
    %c0_i32_73 = arith.constant 0 : i32
    %101 = tpu.memref_slice %arg2[%100, %c0_i32_73] : memref<64x128xi32, #tpu.memory_space<any>> -> memref<1x128xi32, #tpu.memory_space<any>>
    %c6_i32_74 = arith.constant 6 : i32
    %c0_i32_75 = arith.constant 0 : i32
    %102 = tpu.memref_slice %arg4[%c6_i32_74, %c0_i32_75] : memref<8x128xi32, #tpu.memory_space<vmem>> -> memref<1x128xi32, #tpu.memory_space<vmem>>
    %103 = tpu.memref_slice %arg5[%c6_i32_72] : memref<8x!tpu.dma_semaphore, #tpu.memory_space<semaphore_mem>> -> memref<1x!tpu.dma_semaphore, #tpu.memory_space<semaphore_mem>>
    %104 = tpu.memref_squeeze %103 : memref<1x!tpu.dma_semaphore, #tpu.memory_space<semaphore_mem>> -> memref<!tpu.dma_semaphore, #tpu.memory_space<semaphore_mem>>
    tpu.enqueue_dma source(%101 : memref<1x128xi32, #tpu.memory_space<any>>) target(%102 : memref<1x128xi32, #tpu.memory_space<vmem>>) target_semaphore(%104 : memref<!tpu.dma_semaphore, #tpu.memory_space<semaphore_mem>>)
    %c8_i32_76 = arith.constant 8 : i32
    %105 = arith.muli %arg0, %c8_i32_76 : i32
    %c7_i32 = arith.constant 7 : i32
    %106 = arith.addi %105, %c7_i32 : i32
    %107 = arith.index_cast %106 : i32 to index
    %108 = memref.load %arg1[%107] : memref<16xi32, #tpu.memory_space<smem>>
    %c0_i32_77 = arith.constant 0 : i32
    %109 = arith.cmpi sgt, %108, %c0_i32_77 : i32
    %c1_i32_78 = arith.constant 1 : i32
    %110 = arith.subi %108, %c1_i32_78 : i32
    %c3_i32_79 = arith.constant 3 : i32
    %111 = arith.select %109, %110, %c3_i32_79 : i32
    %c0_i32_80 = arith.constant 0 : i32
    %c3_i32_81 = arith.constant 3 : i32
    %112 = arith.maxsi %c0_i32_80, %111 : i32
    %113 = arith.minsi %c3_i32_81, %112 : i32
    %c4_i32_82 = arith.constant 4 : i32
    %114 = arith.muli %106, %c4_i32_82 : i32
    %115 = arith.addi %114, %113 : i32
    %c7_i32_83 = arith.constant 7 : i32
    %c0_i32_84 = arith.constant 0 : i32
    %116 = tpu.memref_slice %arg2[%115, %c0_i32_84] : memref<64x128xi32, #tpu.memory_space<any>> -> memref<1x128xi32, #tpu.memory_space<any>>
    %c7_i32_85 = arith.constant 7 : i32
    %c0_i32_86 = arith.constant 0 : i32
    %117 = tpu.memref_slice %arg4[%c7_i32_85, %c0_i32_86] : memref<8x128xi32, #tpu.memory_space<vmem>> -> memref<1x128xi32, #tpu.memory_space<vmem>>
    %118 = tpu.memref_slice %arg5[%c7_i32_83] : memref<8x!tpu.dma_semaphore, #tpu.memory_space<semaphore_mem>> -> memref<1x!tpu.dma_semaphore, #tpu.memory_space<semaphore_mem>>
    %119 = tpu.memref_squeeze %118 : memref<1x!tpu.dma_semaphore, #tpu.memory_space<semaphore_mem>> -> memref<!tpu.dma_semaphore, #tpu.memory_space<semaphore_mem>>
    tpu.enqueue_dma source(%116 : memref<1x128xi32, #tpu.memory_space<any>>) target(%117 : memref<1x128xi32, #tpu.memory_space<vmem>>) target_semaphore(%119 : memref<!tpu.dma_semaphore, #tpu.memory_space<semaphore_mem>>)
    %c0_i32_87 = arith.constant 0 : i32
    %c0_i32_88 = arith.constant 0 : i32
    %c0_i32_89 = arith.constant 0 : i32
    %120 = tpu.memref_slice %arg2[%c0_i32_88, %c0_i32_89] : memref<64x128xi32, #tpu.memory_space<any>> -> memref<1x128xi32, #tpu.memory_space<any>>
    %c0_i32_90 = arith.constant 0 : i32
    %c0_i32_91 = arith.constant 0 : i32
    %121 = tpu.memref_slice %arg4[%c0_i32_90, %c0_i32_91] : memref<8x128xi32, #tpu.memory_space<vmem>> -> memref<1x128xi32, #tpu.memory_space<vmem>>
    %122 = tpu.memref_slice %arg5[%c0_i32_87] : memref<8x!tpu.dma_semaphore, #tpu.memory_space<semaphore_mem>> -> memref<1x!tpu.dma_semaphore, #tpu.memory_space<semaphore_mem>>
    %123 = tpu.memref_squeeze %122 : memref<1x!tpu.dma_semaphore, #tpu.memory_space<semaphore_mem>> -> memref<!tpu.dma_semaphore, #tpu.memory_space<semaphore_mem>>
    tpu.wait_dma2 semaphore(%123 : memref<!tpu.dma_semaphore, #tpu.memory_space<semaphore_mem>>) src(%120 : memref<1x128xi32, #tpu.memory_space<any>>) dst(%121 : memref<1x128xi32, #tpu.memory_space<vmem>>)
    %c1_i32_92 = arith.constant 1 : i32
    %c0_i32_93 = arith.constant 0 : i32
    %c0_i32_94 = arith.constant 0 : i32
    %124 = tpu.memref_slice %arg2[%c0_i32_93, %c0_i32_94] : memref<64x128xi32, #tpu.memory_space<any>> -> memref<1x128xi32, #tpu.memory_space<any>>
    %c1_i32_95 = arith.constant 1 : i32
    %c0_i32_96 = arith.constant 0 : i32
    %125 = tpu.memref_slice %arg4[%c1_i32_95, %c0_i32_96] : memref<8x128xi32, #tpu.memory_space<vmem>> -> memref<1x128xi32, #tpu.memory_space<vmem>>
    %126 = tpu.memref_slice %arg5[%c1_i32_92] : memref<8x!tpu.dma_semaphore, #tpu.memory_space<semaphore_mem>> -> memref<1x!tpu.dma_semaphore, #tpu.memory_space<semaphore_mem>>
    %127 = tpu.memref_squeeze %126 : memref<1x!tpu.dma_semaphore, #tpu.memory_space<semaphore_mem>> -> memref<!tpu.dma_semaphore, #tpu.memory_space<semaphore_mem>>
    tpu.wait_dma2 semaphore(%127 : memref<!tpu.dma_semaphore, #tpu.memory_space<semaphore_mem>>) src(%124 : memref<1x128xi32, #tpu.memory_space<any>>) dst(%125 : memref<1x128xi32, #tpu.memory_space<vmem>>)
    %c2_i32_97 = arith.constant 2 : i32
    %c0_i32_98 = arith.constant 0 : i32
    %c0_i32_99 = arith.constant 0 : i32
    %128 = tpu.memref_slice %arg2[%c0_i32_98, %c0_i32_99] : memref<64x128xi32, #tpu.memory_space<any>> -> memref<1x128xi32, #tpu.memory_space<any>>
    %c2_i32_100 = arith.constant 2 : i32
    %c0_i32_101 = arith.constant 0 : i32
    %129 = tpu.memref_slice %arg4[%c2_i32_100, %c0_i32_101] : memref<8x128xi32, #tpu.memory_space<vmem>> -> memref<1x128xi32, #tpu.memory_space<vmem>>
    %130 = tpu.memref_slice %arg5[%c2_i32_97] : memref<8x!tpu.dma_semaphore, #tpu.memory_space<semaphore_mem>> -> memref<1x!tpu.dma_semaphore, #tpu.memory_space<semaphore_mem>>
    %131 = tpu.memref_squeeze %130 : memref<1x!tpu.dma_semaphore, #tpu.memory_space<semaphore_mem>> -> memref<!tpu.dma_semaphore, #tpu.memory_space<semaphore_mem>>
    tpu.wait_dma2 semaphore(%131 : memref<!tpu.dma_semaphore, #tpu.memory_space<semaphore_mem>>) src(%128 : memref<1x128xi32, #tpu.memory_space<any>>) dst(%129 : memref<1x128xi32, #tpu.memory_space<vmem>>)
    %c3_i32_102 = arith.constant 3 : i32
    %c0_i32_103 = arith.constant 0 : i32
    %c0_i32_104 = arith.constant 0 : i32
    %132 = tpu.memref_slice %arg2[%c0_i32_103, %c0_i32_104] : memref<64x128xi32, #tpu.memory_space<any>> -> memref<1x128xi32, #tpu.memory_space<any>>
    %c3_i32_105 = arith.constant 3 : i32
    %c0_i32_106 = arith.constant 0 : i32
    %133 = tpu.memref_slice %arg4[%c3_i32_105, %c0_i32_106] : memref<8x128xi32, #tpu.memory_space<vmem>> -> memref<1x128xi32, #tpu.memory_space<vmem>>
    %134 = tpu.memref_slice %arg5[%c3_i32_102] : memref<8x!tpu.dma_semaphore, #tpu.memory_space<semaphore_mem>> -> memref<1x!tpu.dma_semaphore, #tpu.memory_space<semaphore_mem>>
    %135 = tpu.memref_squeeze %134 : memref<1x!tpu.dma_semaphore, #tpu.memory_space<semaphore_mem>> -> memref<!tpu.dma_semaphore, #tpu.memory_space<semaphore_mem>>
    tpu.wait_dma2 semaphore(%135 : memref<!tpu.dma_semaphore, #tpu.memory_space<semaphore_mem>>) src(%132 : memref<1x128xi32, #tpu.memory_space<any>>) dst(%133 : memref<1x128xi32, #tpu.memory_space<vmem>>)
    %c4_i32_107 = arith.constant 4 : i32
    %c0_i32_108 = arith.constant 0 : i32
    %c0_i32_109 = arith.constant 0 : i32
    %136 = tpu.memref_slice %arg2[%c0_i32_108, %c0_i32_109] : memref<64x128xi32, #tpu.memory_space<any>> -> memref<1x128xi32, #tpu.memory_space<any>>
    %c4_i32_110 = arith.constant 4 : i32
    %c0_i32_111 = arith.constant 0 : i32
    %137 = tpu.memref_slice %arg4[%c4_i32_110, %c0_i32_111] : memref<8x128xi32, #tpu.memory_space<vmem>> -> memref<1x128xi32, #tpu.memory_space<vmem>>
    %138 = tpu.memref_slice %arg5[%c4_i32_107] : memref<8x!tpu.dma_semaphore, #tpu.memory_space<semaphore_mem>> -> memref<1x!tpu.dma_semaphore, #tpu.memory_space<semaphore_mem>>
    %139 = tpu.memref_squeeze %138 : memref<1x!tpu.dma_semaphore, #tpu.memory_space<semaphore_mem>> -> memref<!tpu.dma_semaphore, #tpu.memory_space<semaphore_mem>>
    tpu.wait_dma2 semaphore(%139 : memref<!tpu.dma_semaphore, #tpu.memory_space<semaphore_mem>>) src(%136 : memref<1x128xi32, #tpu.memory_space<any>>) dst(%137 : memref<1x128xi32, #tpu.memory_space<vmem>>)
    %c5_i32_112 = arith.constant 5 : i32
    %c0_i32_113 = arith.constant 0 : i32
    %c0_i32_114 = arith.constant 0 : i32
    %140 = tpu.memref_slice %arg2[%c0_i32_113, %c0_i32_114] : memref<64x128xi32, #tpu.memory_space<any>> -> memref<1x128xi32, #tpu.memory_space<any>>
    %c5_i32_115 = arith.constant 5 : i32
    %c0_i32_116 = arith.constant 0 : i32
    %141 = tpu.memref_slice %arg4[%c5_i32_115, %c0_i32_116] : memref<8x128xi32, #tpu.memory_space<vmem>> -> memref<1x128xi32, #tpu.memory_space<vmem>>
    %142 = tpu.memref_slice %arg5[%c5_i32_112] : memref<8x!tpu.dma_semaphore, #tpu.memory_space<semaphore_mem>> -> memref<1x!tpu.dma_semaphore, #tpu.memory_space<semaphore_mem>>
    %143 = tpu.memref_squeeze %142 : memref<1x!tpu.dma_semaphore, #tpu.memory_space<semaphore_mem>> -> memref<!tpu.dma_semaphore, #tpu.memory_space<semaphore_mem>>
    tpu.wait_dma2 semaphore(%143 : memref<!tpu.dma_semaphore, #tpu.memory_space<semaphore_mem>>) src(%140 : memref<1x128xi32, #tpu.memory_space<any>>) dst(%141 : memref<1x128xi32, #tpu.memory_space<vmem>>)
    %c6_i32_117 = arith.constant 6 : i32
    %c0_i32_118 = arith.constant 0 : i32
    %c0_i32_119 = arith.constant 0 : i32
    %144 = tpu.memref_slice %arg2[%c0_i32_118, %c0_i32_119] : memref<64x128xi32, #tpu.memory_space<any>> -> memref<1x128xi32, #tpu.memory_space<any>>
    %c6_i32_120 = arith.constant 6 : i32
    %c0_i32_121 = arith.constant 0 : i32
    %145 = tpu.memref_slice %arg4[%c6_i32_120, %c0_i32_121] : memref<8x128xi32, #tpu.memory_space<vmem>> -> memref<1x128xi32, #tpu.memory_space<vmem>>
    %146 = tpu.memref_slice %arg5[%c6_i32_117] : memref<8x!tpu.dma_semaphore, #tpu.memory_space<semaphore_mem>> -> memref<1x!tpu.dma_semaphore, #tpu.memory_space<semaphore_mem>>
    %147 = tpu.memref_squeeze %146 : memref<1x!tpu.dma_semaphore, #tpu.memory_space<semaphore_mem>> -> memref<!tpu.dma_semaphore, #tpu.memory_space<semaphore_mem>>
    tpu.wait_dma2 semaphore(%147 : memref<!tpu.dma_semaphore, #tpu.memory_space<semaphore_mem>>) src(%144 : memref<1x128xi32, #tpu.memory_space<any>>) dst(%145 : memref<1x128xi32, #tpu.memory_space<vmem>>)
    %c7_i32_122 = arith.constant 7 : i32
    %c0_i32_123 = arith.constant 0 : i32
    %c0_i32_124 = arith.constant 0 : i32
    %148 = tpu.memref_slice %arg2[%c0_i32_123, %c0_i32_124] : memref<64x128xi32, #tpu.memory_space<any>> -> memref<1x128xi32, #tpu.memory_space<any>>
    %c7_i32_125 = arith.constant 7 : i32
    %c0_i32_126 = arith.constant 0 : i32
    %149 = tpu.memref_slice %arg4[%c7_i32_125, %c0_i32_126] : memref<8x128xi32, #tpu.memory_space<vmem>> -> memref<1x128xi32, #tpu.memory_space<vmem>>
    %150 = tpu.memref_slice %arg5[%c7_i32_122] : memref<8x!tpu.dma_semaphore, #tpu.memory_space<semaphore_mem>> -> memref<1x!tpu.dma_semaphore, #tpu.memory_space<semaphore_mem>>
    %151 = tpu.memref_squeeze %150 : memref<1x!tpu.dma_semaphore, #tpu.memory_space<semaphore_mem>> -> memref<!tpu.dma_semaphore, #tpu.memory_space<semaphore_mem>>
    tpu.wait_dma2 semaphore(%151 : memref<!tpu.dma_semaphore, #tpu.memory_space<semaphore_mem>>) src(%148 : memref<1x128xi32, #tpu.memory_space<any>>) dst(%149 : memref<1x128xi32, #tpu.memory_space<vmem>>)
    %c0 = arith.constant 0 : index
    %c0_127 = arith.constant 0 : index
    %152 = vector.load %arg4[%c0, %c0_127] : memref<8x128xi32, #tpu.memory_space<vmem>>, vector<8x128xi32>
    %c0_128 = arith.constant 0 : index
    %c0_129 = arith.constant 0 : index
    %153 = vector.load %arg3[%c0_128, %c0_129] : memref<8x128xi32, #tpu.memory_space<vmem>>, vector<8x128xi32>
    tpu.vector_store %arg3[%c0_128, %c0_129], %152 {strides = array<i32>} : memref<8x128xi32, #tpu.memory_space<vmem>>, vector<8x128xi32>,
    return
  }
  func.func @transform_1(%arg0: i32, %arg1: memref<16xi32, #tpu.memory_space<smem>>) -> (i32, i32) {
    %c0_i32 = arith.constant 0 : i32
    %c0_i32_0 = arith.constant 0 : i32
    return %arg0, %c0_i32 : i32, i32
  }
}

</mosaic_0001>

<bundles_post_ra>
// kernel: tpu_custom_call.1
= control target key start
LH: loop header
LB: loop body
LE: loop exit
PB: predicated region body
PF: predicated region fallthrough
CT: control target
= control target key end

     0   :  { %s1169_s0 = inlined_call_operand.hbm [shape: s32[16], index: 0, kind: input, shape index: {}]   ;;  %s1170_s1 = inlined_call_operand.hbm [shape: s32[64,128], index: 1, kind: input, shape index: {}]   ;;  %s1171_s2 = inlined_call_operand.hbm [shape: s32[16,128], index: 2, kind: output, shape index: {}]  }
   0x1   :  { %s586_s11 = scalar_lea.hbm %s1169_s0, 16 }
   0x2   :  { %p587_p0 = scmp.ne.s32.totalorder %s1169_s0, %s586_s11  ;;  %p590_p1 = scmp.lt.u32.totalorder %s586_s11, %s1169_s0 }
   0x4   :  { %p592_p2 = pnand %p590_p1, %p587_p0 }
   0x6   :  { %595 = shalt.err (!%p592_p2)  }
   0x7   :  { %s869_s16 = smov [#allocation5]  }
   0x8   :  { %8 = dma.hbm_to_smem %s1169_s0, 16, %s869_s16, [#allocation4] }
   0x9   :  { %835 = dma.done.wait [#allocation4], 16 }
   0xa   :  { %836 = vsyncadd [#allocation4], 4294967280 }
   0xb   :  { %10 = sfence }
   0xc   :  { %11 = vsyncpa [#allocation7], 0 }
   0xd   :  { %13 = vsyncpa [#allocation7 + $0x1], 0  ;;  %s906_s19 = smov 0   ;;  %s908_s20 = smov 0  }
   0xe   :  { %s910_s21 = smov 0  }
   0xf LB: > { %s435_s0 = sadd.s32 4294967295, %s867_s21   ;;  %s923_s22 = sadd.s32 1, %s867_s21   ;;  %s867_s21 = sphi %s910_s21, %s1186_s21   ;;  %s863_s20 = sphi %s908_s20, %s1189_s20   ;;  %s859_s19 = sphi %s906_s19, %s1188_s19  }
  0x10   : > { %1175 = sst [smem:[#allocation36_spill]] %s923_s22  ;;  %s22_s23 = ssub.s32 %s867_s21, %s923_s22 }
  0x11   : > { %s25_s24 = sadd.s32 1, %s863_s20  ;;  %p23_p3 = scmp.eq.s32.totalorder %s22_s23, 0 }
  0x12   : > { %p436_p4 = scmp.ne.s32.totalorder %s22_s23, 0  ;;  %p29_p5 = scmp.eq.s32.totalorder %s867_s21, 1 }
  0x13   : > { %p34_p6 = scmp.ne.s32.totalorder %s863_s20, %s859_s19  ;;  %p35_p8 = scmp.eq.s32.totalorder %s435_s0, 1 }
  0x14   : > { %s932_s25 = scalar_select %p23_p3, %s863_s20, %s25_s24  }
  0x15   : > { %p934_p7 = por %p436_p4, %p29_p5  ;;  %p938_p9 = por %p35_p8, %p34_p6 }
  0x16   : > { %1176 = sst [smem:[#allocation37_spill]] %s932_s25  ;;  %p437_p10 = scmp.ge.s32.totalorder %s867_s21, 2 }
  0x17   : > { %s1178_s27 = scalar_select %p938_p9, 1, 0 }
  0x18   : > { %44 = sbr.rel (%p437_p10) target bundleno = 296 (0x128), region = 12  ;;  %s1172_s28 = sand.u32 (!%p437_p10), 1, %s863_s20  }
  0x19   : > { %s945_s29 = sshll.u32 (!%p437_p10), %s867_s21, 3  ;;  %s949_s30 = sshll.u32 (!%p437_p10), %s1172_s28, 3 }
  0x1a   : > { %s53_s3 = sld [smem:[#allocation5 + %s945_s29]] (!%p437_p10)  ;;  %s76_s4 = sadd.s32 (!%p437_p10), 1, %s945_s29 }
  0x1b   : > { %s870_s5 = smov (!%p437_p10), [#allocation2]   ;;  %s77_s7 = sld [smem:[#allocation5 + %s76_s4]] (!%p437_p10) }
  0x1c   : > { %s72_s6 = sshll.u32 (!%p437_p10), %s870_s5, 4  ;;  %s954_s8 = sshll.u32 (!%p437_p10), %s867_s21, 5  ;;  %s956_s6 = int_to_ptr.vmem [resolvable:$true] %s72_s6 }
  0x1d   : > { %s102_s9 = sadd.s32 (!%p437_p10), 2, %s945_s29  ;;  %s871_s11 = smov (!%p437_p10), [#allocation2 + $0x1]  }
  0x1e   : > { %s959_s12 = sshll.u32 (!%p437_p10), %s871_s11, 4  ;;  %s961_s13 = sld [smem:[#allocation5 + %s102_s9]] (!%p437_p10)  ;;  %s99_s12 = int_to_ptr.vmem [resolvable:$true] %s959_s12 }
  0x20   : > { %p54_p11 = scmp.gt.s32.totalorder %s53_s3, 0  ;;  %s440_s10 = sadd.s32 4294967295, %s53_s3 }
  0x21   : > { %p78_p12 = scmp.gt.s32.totalorder %s77_s7, 0  ;;  %s448_s14 = sadd.s32 4294967295, %s77_s7 }
  0x22   : > { %s1191_s10 = smov (!%p54_p11, %s440_s10), 3  ;;  %s977_s7 = scalar_lea.hbm %s1170_s1, 1024 }
  0x23   : > { %p57_p13 = scmp.gt.s32.totalorder %s1191_s10, 0  ;;  %p441_p0 = scmp.lt.s32.totalorder %s1191_s10, 3 }
  0x24   : > { %s1193_s14 = smov (!%p78_p12, %s448_s14), 3  ;;  %s457_s18 = sadd.s32 4294967295, %s961_s13 }
  0x25   : > { %s1195_s10 = smov (!%p57_p13, %s1191_s10), 0  ;;  %p81_p1 = scmp.gt.s32.totalorder %s1193_s14, 0 }
  0x26   : > { %s1197_s10 = smov (!%p441_p0, %s1195_s10), 3 }
  0x27   : > { %s82_s15 = scalar_select %p81_p1, %s1193_s14, 0 }
  0x28   : > { %s62_s16 = sadd.s32 %s1197_s10, %s954_s8 }
  0x29   : > { %s447_s17 = sshll.u32 %s62_s16, 4 }
  0x2a   : > { %s64_s24 = scalar_lea.hbm %s1170_s1, %s447_s17 }
  0x2b   : > { %s596_s3 = scalar_lea.hbm %s64_s24, 16  ;;  %p599_p5 = scmp.lt.u32.totalorder %s64_s24, %s1170_s1 }
  0x2c   : > { %p597_p4 = scmp.ne.s32.totalorder %s64_s24, %s596_s3  ;;  %p600_p6 = scmp.lt.u32.totalorder %s977_s7, %s596_s3 }
  0x2d   : > { %p602_p10 = scmp.lt.u32.totalorder %s596_s3, %s64_s24 }
  0x2e   : > { %p601_p8 = por %p600_p6, %p599_p5 }
  0x30   : > { %p603_p11 = por %p602_p10, %p601_p8 }
  0x32   : > { %p604_p12 = pnand %p603_p11, %p597_p4 }
  0x34   : > { %607 = shalt.err (!%p604_p12)  }
  0x35   : > { %s608_s10 = scalar_lea.vmem %s956_s6, 16  ;;  %s986_s16 = scalar_lea.vmem %s956_s6, 128 }
  0x36   : > { %p609_p13 = scmp.ne.s32.totalorder %s956_s6, %s608_s10  ;;  %p613_p0 = scmp.lt.s32.totalorder %s956_s6, %s956_s6 }
  0x37   : > { %p614_p1 = scmp.lt.s32.totalorder %s986_s16, %s608_s10 }
  0x39   : > { %p615_p3 = por %p614_p1, %p613_p0 }
  0x3b   : > { %p616_p2 = pnand %p615_p3, %p609_p13 }
  0x3d   : > { %619 = shalt.err (!%p616_p2)  }
  0x3e   : > { %75 = dma.hbm_to_vmem [thread:$0]  %s64_s24, 16, %s956_s6, [#allocation3] }
  0x3f   : > { %p1179_p4 = scmp.lt.s32.totalorder %s1193_s14, 3  ;;  %p1180_p5 = scmp.gt.s32.totalorder %s961_s13, 0 }
  0x40   : > { %s872_s5 = smov [#allocation2 + $0x2]  }
  0x41   : > { %s1199_s15 = smov (!%p1179_p4, %s82_s15), 3  ;;  %s1201_s18 = smov (!%p1180_p5, %s457_s18), 3 }
  0x42   : > { %s376_s17 = sadd.s32 %s1199_s15, %s954_s8  ;;  %s124_s9 = sshll.u32 %s872_s5, 4  ;;  %s125_s9 = int_to_ptr.vmem [resolvable:$true] %s124_s9 }
  0x43   : > { %s456_s0 = sshll.u32 %s376_s17, 4 }
  0x44   : > { %s378_s4 = scalar_lea.hbm %s1170_s1, %s456_s0 }
  0x45   : > { %s379_s11 = scalar_lea.hbm %s378_s4, 64  ;;  %s644_s24 = scalar_lea.hbm %s378_s4, 80 }
  0x46   : > { %p621_p3 = scmp.ne.s32.totalorder %s379_s11, %s644_s24  ;;  %p623_p8 = scmp.lt.u32.totalorder %s379_s11, %s1170_s1 }
  0x47   : > { %p624_p10 = scmp.lt.u32.totalorder %s977_s7, %s644_s24  ;;  %p626_p12 = scmp.lt.u32.totalorder %s644_s24, %s379_s11 }
  0x49   : > { %p625_p11 = por %p624_p10, %p623_p8 }
  0x4b   : > { %p627_p13 = por %p626_p12, %p625_p11 }
  0x4d   : > { %p628_p0 = pnand %p627_p13, %p621_p3 }
  0x4f   : > { %631 = shalt.err (!%p628_p0)  }
  0x50   : > { %s632_s15 = scalar_lea.vmem %s99_s12, 16  ;;  %p637_p4 = scmp.lt.s32.totalorder %s99_s12, %s956_s6 }
  0x51   : > { %p633_p1 = scmp.ne.s32.totalorder %s99_s12, %s632_s15  ;;  %p638_p5 = scmp.lt.s32.totalorder %s986_s16, %s632_s15 }
  0x53   : > { %p639_p6 = por %p638_p5, %p637_p4 }
  0x55   : > { %p640_p2 = pnand %p639_p6, %p633_p1 }
  0x57   : > { %643 = shalt.err (!%p640_p2)  }
  0x58   : > { %101 = dma.hbm_to_vmem [thread:$0]  %s379_s11, 16, %s99_s12, [#allocation3 + $0x1] }
  0x59   : > { %p1181_p9 = scmp.gt.s32.totalorder %s1201_s18, 0  ;;  %s128_s17 = sadd.s32 3, %s945_s29 }
  0x5a   : > { %p1182_p3 = scmp.lt.s32.totalorder %s1201_s18, 3  ;;  %s1017_s0 = sld [smem:[#allocation5 + %s128_s17]] }
  0x5b   : > { %s108_s10 = scalar_select %p1181_p9, %s1201_s18, 0 }
  0x5c   : > { %s154_s4 = sadd.s32 4, %s945_s29  ;;  %s873_s13 = smov [#allocation2 + $0x3]  }
  0x5d   : > { %s1203_s10 = smov (!%p1182_p3, %s108_s10), 3  ;;  %s1024_s24 = sld [smem:[#allocation5 + %s154_s4]] }
  0x5e   : > { %s382_s23 = sadd.s32 %s1203_s10, %s954_s8  ;;  %s150_s15 = sshll.u32 %s873_s13, 4  ;;  %s1034_s15 = int_to_ptr.vmem [resolvable:$true] %s150_s15 }
  0x5f   : > { %s465_s3 = sshll.u32 %s382_s23, 4 }
  0x60   : > { %s384_s11 = scalar_lea.hbm %s1170_s1, %s465_s3 }
  0x61   : > { %s385_s14 = scalar_lea.hbm %s384_s11, 128  ;;  %s669_s28 = scalar_lea.hbm %s384_s11, 144 }
  0x62   : > { %p646_p9 = scmp.ne.s32.totalorder %s385_s14, %s669_s28  ;;  %p648_p6 = scmp.lt.u32.totalorder %s385_s14, %s1170_s1 }
  0x63   : > { %p649_p2 = scmp.lt.u32.totalorder %s977_s7, %s669_s28  ;;  %p651_p10 = scmp.lt.u32.totalorder %s669_s28, %s385_s14 }
  0x65   : > { %p650_p8 = por %p649_p2, %p648_p6 }
  0x67   : > { %p652_p11 = por %p651_p10, %p650_p8 }
  0x69   : > { %p653_p12 = pnand %p652_p11, %p646_p9 }
  0x6b   : > { %656 = shalt.err (!%p653_p12)  }
  0x6c   : > { %s657_s10 = scalar_lea.vmem %s125_s9, 16  ;;  %p662_p0 = scmp.lt.s32.totalorder %s125_s9, %s956_s6 }
  0x6d   : > { %p658_p13 = scmp.ne.s32.totalorder %s125_s9, %s657_s10  ;;  %p663_p1 = scmp.lt.s32.totalorder %s986_s16, %s657_s10 }
  0x6f   : > { %p664_p4 = por %p663_p1, %p662_p0 }
  0x71   : > { %p665_p5 = pnand %p664_p4, %p658_p13 }
  0x73   : > { %668 = shalt.err (!%p665_p5)  }
  0x74   : > { %127 = dma.hbm_to_vmem [thread:$0]  %s385_s14, 16, %s125_s9, [#allocation3 + $0x2] }
  0x75   : > { %p130_p3 = scmp.gt.s32.totalorder %s1017_s0, 0  ;;  %s466_s25 = sadd.s32 4294967295, %s1017_s0 }
  0x76   : > { %p156_p9 = scmp.gt.s32.totalorder %s1024_s24, 0  ;;  %s475_s28 = sadd.s32 4294967295, %s1024_s24 }
  0x77   : > { %s1205_s25 = smov (!%p130_p3, %s466_s25), 3  ;;  %s180_s9 = sadd.s32 5, %s945_s29 }
  0x78   : > { %p133_p6 = scmp.gt.s32.totalorder %s1205_s25, 0  ;;  %p467_p2 = scmp.lt.s32.totalorder %s1205_s25, 3 }
  0x79   : > { %s1207_s28 = smov (!%p156_p9, %s475_s28), 3  ;;  %s1045_s3 = sld [smem:[#allocation5 + %s180_s9]] }
  0x7a   : > { %s1209_s25 = smov (!%p133_p6, %s1205_s25), 0  ;;  %p159_p8 = scmp.gt.s32.totalorder %s1207_s28, 0 }
  0x7b   : > { %s1211_s25 = smov (!%p467_p2, %s1209_s25), 3  ;;  %p476_p10 = scmp.lt.s32.totalorder %s1207_s28, 3 }
  0x7c   : > { %s160_s17 = scalar_select %p159_p8, %s1207_s28, 0 }
  0x7d   : > { %s388_s23 = sadd.s32 %s1211_s25, %s954_s8  ;;  %s874_s24 = smov [#allocation2 + $0x4]  }
  0x7e   : > { %s474_s0 = sshll.u32 %s388_s23, 4  ;;  %s176_s14 = sshll.u32 %s874_s24, 4  ;;  %s177_s14 = int_to_ptr.vmem [resolvable:$true] %s176_s14 }
  0x7f   : > { %s390_s12 = scalar_lea.hbm %s1170_s1, %s474_s0 }
  0x80   : > { %s391_s11 = scalar_lea.hbm %s390_s12, 192  ;;  %s694_s13 = scalar_lea.hbm %s390_s12, 208 }
  0x81   : > { %p671_p11 = scmp.ne.s32.totalorder %s391_s11, %s694_s13  ;;  %p673_p12 = scmp.lt.u32.totalorder %s391_s11, %s1170_s1 }
  0x82   : > { %p674_p13 = scmp.lt.u32.totalorder %s977_s7, %s694_s13  ;;  %p676_p1 = scmp.lt.u32.totalorder %s694_s13, %s391_s11 }
  0x84   : > { %p675_p0 = por %p674_p13, %p673_p12 }
  0x86   : > { %p677_p4 = por %p676_p1, %p675_p0 }
  0x88   : > { %p678_p5 = pnand %p677_p4, %p671_p11 }
  0x8a   : > { %681 = shalt.err (!%p678_p5)  }
  0x8b   : > { %s682_s25 = scalar_lea.vmem %s1034_s15, 16  ;;  %p687_p9 = scmp.lt.s32.totalorder %s1034_s15, %s956_s6 }
  0x8c   : > { %p683_p3 = scmp.ne.s32.totalorder %s1034_s15, %s682_s25  ;;  %p688_p6 = scmp.lt.s32.totalorder %s986_s16, %s682_s25 }
  0x8e   : > { %p689_p2 = por %p688_p6, %p687_p9 }
  0x90   : > { %p690_p8 = pnand %p689_p2, %p683_p3 }
  0x92   : > { %693 = shalt.err (!%p690_p8)  }
  0x93   : > { %153 = dma.hbm_to_vmem [thread:$0]  %s391_s11, 16, %s1034_s15, [#allocation3 + $0x3] }
  0x94   : > { %s1213_s17 = smov (!%p476_p10, %s160_s17), 3  ;;  %s206_s9 = sadd.s32 6, %s945_s29 }
  0x95   : > { %s394_s23 = sadd.s32 %s1213_s17, %s954_s8  ;;  %p182_p11 = scmp.gt.s32.totalorder %s1045_s3, 0 }
  0x96   : > { %s483_s0 = sshll.u32 %s394_s23, 4  ;;  %s484_s4 = sadd.s32 4294967295, %s1045_s3 }
  0x97   : > { %s396_s24 = scalar_lea.hbm %s1170_s1, %s483_s0  ;;  %s207_s13 = sld [smem:[#allocation5 + %s206_s9]] }
  0x98   : > { %s397_s18 = scalar_lea.hbm %s396_s24, 256  ;;  %s719_s10 = scalar_lea.hbm %s396_s24, 272 }
  0x99   : > { %p696_p12 = scmp.ne.s32.totalorder %s397_s18, %s719_s10  ;;  %p698_p13 = scmp.lt.u32.totalorder %s397_s18, %s1170_s1 }
  0x9a   : > { %p699_p0 = scmp.lt.u32.totalorder %s977_s7, %s719_s10  ;;  %p701_p1 = scmp.lt.u32.totalorder %s719_s10, %s397_s18 }
  0x9c   : > { %p700_p10 = por %p699_p0, %p698_p13 }
  0x9e   : > { %p702_p4 = por %p701_p1, %p700_p10 }
  0xa0   : > { %p703_p5 = pnand %p702_p4, %p696_p12 }
  0xa2   : > { %706 = shalt.err (!%p703_p5)  }
  0xa3   : > { %s707_s15 = scalar_lea.vmem %s177_s14, 16  ;;  %p712_p9 = scmp.lt.s32.totalorder %s177_s14, %s956_s6 }
  0xa4   : > { %p708_p3 = scmp.ne.s32.totalorder %s177_s14, %s707_s15  ;;  %p713_p6 = scmp.lt.s32.totalorder %s986_s16, %s707_s15 }
  0xa6   : > { %p714_p2 = por %p713_p6, %p712_p9 }
  0xa8   : > { %p715_p8 = pnand %p714_p2, %p708_p3 }
  0xaa   : > { %718 = shalt.err (!%p715_p8)  }
  0xab   : > { %179 = dma.hbm_to_vmem [thread:$0]  %s397_s18, 16, %s177_s14, [#allocation3 + $0x4] }
  0xac   : > { %s1215_s4 = smov (!%p182_p11, %s484_s4), 3  ;;  %s875_s22 = smov [#allocation2 + $0x5]  }
  0xad   : > { %s202_s28 = sshll.u32 %s875_s22, 4  ;;  %p185_p13 = scmp.gt.s32.totalorder %s1215_s4, 0  ;;  %s203_s28 = int_to_ptr.vmem [resolvable:$true] %s202_s28 }
  0xae   : > { %p485_p12 = scmp.lt.s32.totalorder %s1215_s4, 3  ;;  %p208_p0 = scmp.gt.s32.totalorder %s207_s13, 0 }
  0xaf   : > { %s493_s17 = sadd.s32 4294967295, %s207_s13  ;;  %s1217_s4 = smov (!%p185_p13, %s1215_s4), 0 }
  0xb0   : > { %s1219_s17 = smov (!%p208_p0, %s493_s17), 3  ;;  %s1221_s4 = smov (!%p485_p12, %s1217_s4), 3 }
  0xb1   : > { %s232_s11 = sadd.s32 7, %s945_s29  ;;  %s400_s14 = sadd.s32 %s1221_s4, %s954_s8 }
  0xb2   : > { %s492_s3 = sshll.u32 %s400_s14, 4  ;;  %p211_p10 = scmp.gt.s32.totalorder %s1219_s17, 0 }
  0xb3   : > { %s402_s0 = scalar_lea.hbm %s1170_s1, %s492_s3  ;;  %s1085_s5 = sld [smem:[#allocation5 + %s232_s11]] }
  0xb4   : > { %s403_s12 = scalar_lea.hbm %s402_s0, 320  ;;  %s744_s24 = scalar_lea.hbm %s402_s0, 336 }
  0xb5   : > { %p721_p1 = scmp.ne.s32.totalorder %s403_s12, %s744_s24  ;;  %p723_p4 = scmp.lt.u32.totalorder %s403_s12, %s1170_s1 }
  0xb6   : > { %p724_p5 = scmp.lt.u32.totalorder %s977_s7, %s744_s24  ;;  %p726_p9 = scmp.lt.u32.totalorder %s744_s24, %s403_s12 }
  0xb8   : > { %p725_p3 = por %p724_p5, %p723_p4 }
  0xba   : > { %p727_p6 = por %p726_p9, %p725_p3 }
  0xbc   : > { %p728_p2 = pnand %p727_p6, %p721_p1 }
  0xbe   : > { %731 = shalt.err (!%p728_p2)  }
  0xbf   : > { %s732_s29 = scalar_lea.vmem %s203_s28, 16  ;;  %p737_p13 = scmp.lt.s32.totalorder %s203_s28, %s956_s6 }
  0xc0   : > { %p733_p8 = scmp.ne.s32.totalorder %s203_s28, %s732_s29  ;;  %p738_p12 = scmp.lt.s32.totalorder %s986_s16, %s732_s29 }
  0xc2   : > { %p739_p0 = por %p738_p12, %p737_p13 }
  0xc4   : > { %p740_p11 = pnand %p739_p0, %p733_p8 }
  0xc6   : > { %743 = shalt.err (!%p740_p11)  }
  0xc7   : > { %205 = dma.hbm_to_vmem [thread:$0]  %s403_s12, 16, %s203_s28, [#allocation3 + $0x5] }
  0xc8   : > { %s212_s4 = scalar_select %p211_p10, %s1219_s17, 0 }
  0xc9   : > { %s876_s10 = smov [#allocation2 + $0x6]   ;;  %p1183_p1 = scmp.lt.s32.totalorder %s1219_s17, 3 }
  0xca   : > { %s228_s25 = sshll.u32 %s876_s10, 4  ;;  %p234_p4 = scmp.gt.s32.totalorder %s1085_s5, 0  ;;  %s229_s25 = int_to_ptr.vmem [resolvable:$true] %s228_s25 }
  0xcb   : > { %s1223_s4 = smov (!%p1183_p1, %s212_s4), 3  ;;  %s502_s3 = sadd.s32 4294967295, %s1085_s5 }
  0xcc   : > { %s406_s15 = sadd.s32 %s1223_s4, %s954_s8 }
  0xcd   : > { %s501_s22 = sshll.u32 %s406_s15, 4 }
  0xce   : > { %s408_s28 = scalar_lea.hbm %s1170_s1, %s501_s22 }
  0xcf   : > { %s409_s9 = scalar_lea.hbm %s408_s28, 384  ;;  %s769_s23 = scalar_lea.hbm %s408_s28, 400 }
  0xd0   : > { %p746_p11 = scmp.ne.s32.totalorder %s409_s9, %s769_s23  ;;  %p748_p10 = scmp.lt.u32.totalorder %s409_s9, %s1170_s1 }
  0xd1   : > { %p749_p5 = scmp.lt.u32.totalorder %s977_s7, %s769_s23  ;;  %p751_p9 = scmp.lt.u32.totalorder %s769_s23, %s409_s9 }
  0xd3   : > { %p750_p3 = por %p749_p5, %p748_p10 }
  0xd5   : > { %p752_p6 = por %p751_p9, %p750_p3 }
  0xd7   : > { %p753_p2 = pnand %p752_p6, %p746_p11 }
  0xd9   : > { %756 = shalt.err (!%p753_p2)  }
  0xda   : > { %s757_s17 = scalar_lea.vmem %s229_s25, 16  ;;  %p762_p13 = scmp.lt.s32.totalorder %s229_s25, %s956_s6 }
  0xdb   : > { %p758_p8 = scmp.ne.s32.totalorder %s229_s25, %s757_s17  ;;  %p763_p12 = scmp.lt.s32.totalorder %s986_s16, %s757_s17 }
  0xdd   : > { %p764_p0 = por %p763_p12, %p762_p13 }
  0xdf   : > { %p765_p1 = pnand %p764_p0, %p758_p8 }
  0xe1   : > { %768 = shalt.err (!%p765_p1)  }
  0xe2   : > { %231 = dma.hbm_to_vmem [thread:$0]  %s409_s9, 16, %s229_s25, [#allocation3 + $0x6] }
  0xe3   : > { %s1225_s3 = smov (!%p234_p4, %s502_s3), 3  ;;  %s877_s24 = smov [#allocation2 + $0x7]  }
  0xe4   : > { %p237_p10 = scmp.gt.s32.totalorder %s1225_s3, 0  ;;  %p503_p5 = scmp.lt.s32.totalorder %s1225_s3, 3 }
  0xe5   : > { %s254_s13 = sshll.u32 %s877_s24, 4  ;;  %s255_s13 = int_to_ptr.vmem [resolvable:$true] %s254_s13 }
  0xe6   : > { %s1227_s3 = smov (!%p237_p10, %s1225_s3), 0 }
  0xe7   : > { %s1229_s3 = smov (!%p503_p5, %s1227_s3), 3 }
  0xe8   : > { %s412_s18 = sadd.s32 %s1229_s3, %s954_s8 }
  0xe9   : > { %s510_s29 = sshll.u32 %s412_s18, 4 }
  0xea   : > { %s414_s15 = scalar_lea.hbm %s1170_s1, %s510_s29 }
  0xeb   : > { %s415_s22 = scalar_lea.hbm %s414_s15, 448  ;;  %s794_s25 = scalar_lea.hbm %s414_s15, 464 }
  0xec   : > { %p771_p11 = scmp.ne.s32.totalorder %s415_s22, %s794_s25  ;;  %p773_p4 = scmp.lt.u32.totalorder %s415_s22, %s1170_s1 }
  0xed   : > { %p774_p3 = scmp.lt.u32.totalorder %s977_s7, %s794_s25  ;;  %p776_p6 = scmp.lt.u32.totalorder %s794_s25, %s415_s22 }
  0xef   : > { %p775_p9 = por %p774_p3, %p773_p4 }
  0xf1   : > { %p777_p2 = por %p776_p6, %p775_p9 }
  0xf3   : > { %p778_p8 = pnand %p777_p2, %p771_p11 }
  0xf5   : > { %781 = shalt.err (!%p778_p8)  }
  0xf6   : > { %s782_s8 = scalar_lea.vmem %s255_s13, 16  ;;  %p787_p12 = scmp.lt.s32.totalorder %s255_s13, %s956_s6 }
  0xf7   : > { %p783_p13 = scmp.ne.s32.totalorder %s255_s13, %s782_s8  ;;  %p788_p0 = scmp.lt.s32.totalorder %s986_s16, %s782_s8 }
  0xf9   : > { %p789_p1 = por %p788_p0, %p787_p12 }
  0xfb   : > { %p790_p10 = pnand %p789_p1, %p783_p13 }
  0xfd   : > { %793 = shalt.err (!%p790_p10)  }
  0xfe   : > { %257 = dma.hbm_to_vmem [thread:$0]  %s415_s22, 16, %s255_s13, [#allocation3 + $0x7] }
  0xff   : > { %s51_s14 = scalar_lea.vmem [#allocation6], %s949_s30 }
 0x100   : > { %837 = dma.done.wait [#allocation3], 16 }
 0x101   : > { %838 = vsyncadd [#allocation3], 4294967280 }
 0x102   : > { %839 = dma.done.wait [#allocation3 + $0x1], 16 }
 0x103   : > { %840 = vsyncadd [#allocation3 + $0x1], 4294967280 }
 0x104   : > { %841 = dma.done.wait [#allocation3 + $0x2], 16 }
 0x105   : > { %842 = vsyncadd [#allocation3 + $0x2], 4294967280 }
 0x106   : > { %843 = dma.done.wait [#allocation3 + $0x3], 16 }
 0x107   : > { %844 = vsyncadd [#allocation3 + $0x3], 4294967280 }
 0x108   : > { %845 = dma.done.wait [#allocation3 + $0x4], 16 }
 0x109   : > { %846 = vsyncadd [#allocation3 + $0x4], 4294967280 }
 0x10a   : > { %847 = dma.done.wait [#allocation3 + $0x5], 16 }
 0x10b   : > { %848 = vsyncadd [#allocation3 + $0x5], 4294967280 }
 0x10c   : > { %849 = dma.done.wait [#allocation3 + $0x6], 16 }
 0x10d   : > { %850 = vsyncadd [#allocation3 + $0x6], 4294967280 }
 0x10e   : > { %851 = dma.done.wait [#allocation3 + $0x7], 16 }
 0x10f   : > { %852 = vsyncadd [#allocation3 + $0x7], 4294967280  ;;  %s512_s30 = sshll.u32 %s867_s21, 7  ;;  %s291_s6 = sshll.u32 %s51_s14, 4  ;;  %v275_v0 = vld [vmem:[#allocation2] sm:$0xff]  ;;  %s1130_s6 = int_to_ptr.vmem [resolvable:$true] %s291_s6 }
 0x110   : > { %s1128_s28 = scalar_lea.hbm %s1171_s2, %s512_s30  ;;  %276 = vst [vmem:[%s51_s14] sm:$0xff] %v275_v0  ;;  %s1184_s3 = sand.u32 1, %s863_s20  }
 0x111   : > { %s278_s9 = scalar_lea.sflag [#allocation7], %s1184_s3  ;;  %s795_s23 = scalar_lea.vmem %s1130_s6, 128 }
 0x112   : > { %p796_p5 = scmp.ne.s32.totalorder %s1130_s6, %s795_s23  ;;  %s878_s0 = smov [#allocation6]  }
 0x113   : > { %s799_s12 = sshll.u32 %s878_s0, 4  ;;  %s800_s12 = int_to_ptr.vmem [resolvable:$false] %s799_s12 }
 0x114   : > { %p797_p11 = pnand %p796_p5, %p934_p7  ;;  %s801_s17 = scalar_lea.vmem %s800_s12, 256 }
 0x115   : > { %p802_p3 = scmp.lt.s32.totalorder %s1130_s6, %s800_s12  ;;  %p803_p9 = scmp.lt.s32.totalorder %s801_s17, %s795_s23 }
 0x116   : > { %p798_p4 = pneg %p797_p11 }
 0x117   : > { %p804_p6 = por %p803_p9, %p802_p3 }
 0x119   : > { %p805_p2 = pnand %p804_p6, %p798_p4 }
 0x11b   : > { %808 = shalt.err (!%p805_p2)
}
 0x11c   : > { %s809_s24 = scalar_lea.hbm %s1128_s28, 128  ;;  %s813_s29 = scalar_lea.hbm %s1171_s2, 256 }
 0x11d   : > { %p810_p8 = scmp.ne.s32.totalorder %s1128_s28, %s809_s24  ;;  %p814_p0 = scmp.lt.u32.totalorder %s1128_s28, %s1171_s2 }
 0x11e   : > { %p815_p1 = scmp.lt.u32.totalorder %s813_s29, %s809_s24  ;;  %p817_p5 = scmp.lt.u32.totalorder %s809_s24, %s1128_s28 }
 0x11f   : > { %p811_p13 = pnand %p810_p8, %p934_p7 }
 0x120   : > { %p816_p10 = por %p815_p1, %p814_p0 }
 0x121   : > { %p812_p12 = pneg %p811_p13 }
 0x122   : > { %p818_p11 = por %p817_p5, %p816_p10 }
 0x124   : > { %p819_p4 = pnand %p818_p11, %p812_p12 }
 0x126   : > { %822 = shalt.err (!%p819_p4)
}
 0x127   : > { %546 = dma.vmem_to_hbm [thread:$0]  (%p934_p7), %s1130_s6, 128, %s1128_s28, %s278_s9  }
 0x128 PF: > { %p552_p3 = scmp.ge.s32.totalorder %s867_s21, 1  ;;  %s303_s15 = sand.u32 1, %s859_s19  }
 0x129   : > { %p1185_p9 = scmp.ne.s32.totalorder %s1178_s27, 0  ;;  %s304_s22 = scalar_lea.sflag [#allocation7], %s303_s15 }
 0x12b   : > { %p549_p6 = pnand %p552_p3, %p1185_p9 }
 0x12d   : > { %854 = dma.done.wait (!%p549_p6), %s304_s22, 128  }
 0x12e   : > { %856 = vsyncadd (!%p549_p6), %s304_s22, 4294967168  ;;  %s1186_s21 = sld [smem:[#allocation36_spill]]  ;;  %s1187_s25 = sld [smem:[#allocation37_spill]] }
 0x12f   : > { %s1188_s19 = smov %s863_s20 }
 0x134   : > { %p16_p2 = scmp.ge.s32.totalorder %s1186_s21, 3   ;;  %s1189_s20 = smov %s1187_s25 }
 0x136   :  { %18 = sbr.rel (!%p16_p2) target bundleno = 15 (0xf), region = 105 }
 0x13d   :  { %309 = vsyncpa [#allocation7], 1 }
 0x13e   :  { %311 = vsyncpa [#allocation7 + $0x1], 1 }
 0x13f   :  { %312 = vsyncmov [#allocation3] }
 0x142   :  { %s313_s26 = vpop.sfrf %312 }
 0x143   :  { %p515_p7 = scmp.ne.s32.totalorder %s313_s26, 0 }
 0x145   :  { %317 = shalt.err (%p515_p7)  }
 0x146   :  { %319 = vsyncmov [#allocation3 + $0x1] }
 0x149   :  { %s320_s27 = vpop.sfrf %319 }
 0x14a   :  { %p516_p8 = scmp.ne.s32.totalorder %s320_s27, 0 }
 0x14c   :  { %324 = shalt.err (%p516_p8)  }
 0x14d   :  { %326 = vsyncmov [#allocation3 + $0x2] }
 0x150   :  { %s327_s5 = vpop.sfrf %326 }
 0x151   :  { %p517_p13 = scmp.ne.s32.totalorder %s327_s5, 0 }
 0x153   :  { %331 = shalt.err (%p517_p13)  }
 0x154   :  { %333 = vsyncmov [#allocation3 + $0x3] }
 0x157   :  { %s334_s11 = vpop.sfrf %333 }
 0x158   :  { %p518_p12 = scmp.ne.s32.totalorder %s334_s11, 0 }
 0x15a   :  { %338 = shalt.err (%p518_p12)  }
 0x15b   :  { %340 = vsyncmov [#allocation3 + $0x4] }
 0x15e   :  { %s341_s21 = vpop.sfrf %340 }
 0x15f   :  { %p519_p0 = scmp.ne.s32.totalorder %s341_s21, 0 }
 0x161   :  { %345 = shalt.err (%p519_p0)  }
 0x162   :  { %347 = vsyncmov [#allocation3 + $0x5] }
 0x165   :  { %s348_s1 = vpop.sfrf %347 }
 0x166   :  { %p520_p1 = scmp.ne.s32.totalorder %s348_s1, 0 }
 0x168   :  { %352 = shalt.err (%p520_p1)  }
 0x169   :  { %354 = vsyncmov [#allocation3 + $0x6] }
 0x16c   :  { %s355_s2 = vpop.sfrf %354 }
 0x16d   :  { %p521_p10 = scmp.ne.s32.totalorder %s355_s2, 0 }
 0x16f   :  { %359 = shalt.err (%p521_p10)  }
 0x170   :  { %361 = vsyncmov [#allocation3 + $0x7] }
 0x173   :  { %s362_s19 = vpop.sfrf %361 }
 0x174   :  { %p522_p5 = scmp.ne.s32.totalorder %s362_s19, 0 }
 0x176   :  { %366 = shalt.err (%p522_p5)  }

</bundles_post_ra>
